<compile_context>
chip_gen: v7x
topology: tpu7x:2x2x1
jax: 0.10.0
libtpu: 0.0.40
codegen_flags: <defaults>
</compile_context>

<pallas_src>
import jax
import jax.numpy as jnp
import numpy as np
from jax.experimental import pallas as pl
from jax.experimental.pallas import tpu as pltpu


def _round_up(x, m):
    return ((x + m - 1) // m) * m


def _late_fusion_kernel(lens_ref, wav_ref, vid_ref,
                        wfa_ref, wfv_ref, bf_ref, out_ref):
    # ---- audio path: mask samples past wav_lens, then folded head matmul ----
    wav = wav_ref[...]                                            # (TM, T) bf16
    lens = lens_ref[...]                                          # (TM, 1) i32
    t_idx = jax.lax.broadcasted_iota(jnp.int32, wav.shape, 1)     # (TM, T)
    wav_m = jnp.where(t_idx < lens, wav, jnp.zeros((), wav.dtype))

    acc = jnp.dot(wav_m, wfa_ref[...],
                  preferred_element_type=jnp.float32)             # (TM, Cp) f32
    # ---- video path: flattened NCHW frame through folded head matmul ----
    acc = acc + jnp.dot(vid_ref[...], wfv_ref[...],
                        preferred_element_type=jnp.float32)       # (TM, Cp)
    # ---- fused bias (already contains ba@Wla + bla + bv@Wlv + blv, *0.5) ----
    out_ref[...] = (acc + bf_ref[...]).astype(out_ref.dtype)


def late_fusion_forward(wav, wav_lens, vid, params,
                        *, compute_dtype=jnp.bfloat16):
    """wav: (B, T) f32, wav_lens: (B,) int, vid: (B, C, H, W) f32 (NCHW)."""
    Wa, ba, Wv, bv, Wla, bla, Wlv, blv = params
    B, T = wav.shape
    CHW = Wv.shape[0]
    num_classes = Wla.shape[1]

    # -------- lane-dense class axis: pad to a multiple of 128 (zeros) --------
    C_PAD = _round_up(max(num_classes, 128), 128)
    Wla_p = jnp.zeros((Wla.shape[0], C_PAD), jnp.float32).at[:, :num_classes].set(Wla)
    Wlv_p = jnp.zeros((Wlv.shape[0], C_PAD), jnp.float32).at[:, :num_classes].set(Wlv)
    bla_p = jnp.zeros((1, C_PAD), jnp.float32).at[:, :num_classes].set(bla)
    blv_p = jnp.zeros((1, C_PAD), jnp.float32).at[:, :num_classes].set(blv)

    # -------- fold linear encoders + 0.5 averaging into the fusion heads -----
    # (valid because the synthetic audio/video encoders are linear)
    Wfa = (0.5 * (Wa @ Wla_p)).astype(compute_dtype)              # (T,   C_PAD)
    Wfv = (0.5 * (Wv @ Wlv_p)).astype(compute_dtype)              # (CHW, C_PAD)
    bf = 0.5 * (ba @ Wla_p + bla_p + bv @ Wlv_p + blv_p)          # (1,   C_PAD) f32

    # -------- batch tiling: TM rows per grid step, pad B up to grid -----------
    vid_flat = vid.reshape(B, -1)                                 # (B, CHW) row-major == torch.flatten
    TM = min(128, _round_up(B, 8))
    B_pad = _round_up(B, TM)
    pad = B_pad - B
    wav_p = jnp.pad(wav, ((0, pad), (0, 0))).astype(compute_dtype)
    vid_p = jnp.pad(vid_flat, ((0, pad), (0, 0))).astype(compute_dtype)
    lens_p = jnp.pad(wav_lens.astype(jnp.int32), (0, pad)).reshape(B_pad, 1)

    grid = (B_pad // TM,)
    out = pl.pallas_call(
        _late_fusion_kernel,
        out_shape=jax.ShapeDtypeStruct((B_pad, C_PAD), jnp.float32),
        grid_spec=pltpu.PrefetchScalarGridSpec(
            num_scalar_prefetch=0,
            grid=grid,
            in_specs=[
                pl.BlockSpec((TM, 1), lambda i: (i, 0)),          # wav_lens
                pl.BlockSpec((TM, T), lambda i: (i, 0)),          # wav
                pl.BlockSpec((TM, CHW), lambda i: (i, 0)),        # vid (flat)
                pl.BlockSpec((T, C_PAD), lambda i: (0, 0)),       # Wfa (resident)
                pl.BlockSpec((CHW, C_PAD), lambda i: (0, 0)),     # Wfv (resident)
                pl.BlockSpec((1, C_PAD), lambda i: (0, 0)),       # fused bias
            ],
            out_specs=pl.BlockSpec((TM, C_PAD), lambda i: (i, 0)),
        ),
        compiler_params=pltpu.CompilerParams(
            dimension_semantics=("parallel",)),
    )(lens_p, wav_p, vid_p, Wfa, Wfv, bf)

    return out[:B, :num_classes]


def _reference(wav, wav_lens, vid, params):
    """Pure-JAX f32 reference of the un-folded LateFusion forward."""
    Wa, ba, Wv, bv, Wla, bla, Wlv, blv = params
    B, T = wav.shape
    mask = (jnp.arange(T)[None, :] < wav_lens[:, None]).astype(wav.dtype)
    a = (wav * mask) @ Wa + ba
    v = vid.reshape(B, -1) @ Wv + bv
    return 0.5 * ((a @ Wla + bla) + (v @ Wlv + blv))


if __name__ == "__main__":
    # Small, deterministic shapes.
    B, T = 8, 128                 # audio: batch, waveform length
    C, H, W = 3, 16, 16           # video: NCHW frame
    A_DIM, V_DIM = 32, 32         # encoder out_dims
    NUM_CLASSES = 10

    key = jax.random.PRNGKey(0)
    keys = jax.random.split(key, 12)

    wav = jax.random.normal(keys[0], (B, T), dtype=jnp.float32)
    wav_lens = jax.random.randint(keys[1], (B,), minval=T // 2, maxval=T + 1)
    vid = jax.random.normal(keys[2], (B, C, H, W), dtype=jnp.float32)

    def init(k, shape, fan_in):
        return (jax.random.normal(k, shape, dtype=jnp.float32)
                / jnp.sqrt(jnp.float32(fan_in)))

    chw = C * H * W
    Wa = init(keys[3], (T, A_DIM), T)
    ba = jnp.zeros((1, A_DIM), jnp.float32)
    Wv = init(keys[4], (chw, V_DIM), chw)
    bv = jnp.zeros((1, V_DIM), jnp.float32)
    Wla = init(keys[5], (A_DIM, NUM_CLASSES), A_DIM)
    bla = init(keys[6], (1, NUM_CLASSES), NUM_CLASSES)
    Wlv = init(keys[7], (V_DIM, NUM_CLASSES), V_DIM)
    blv = init(keys[8], (1, NUM_CLASSES), NUM_CLASSES)

    params = (Wa, ba, Wv, bv, Wla, bla, Wlv, blv)

    logits = late_fusion_forward(wav, wav_lens, vid, params)
    logits = jax.block_until_ready(logits)

    ref = _reference(wav, wav_lens, vid, params)
    # bf16 weights/activations with f32 accumulation -> loose-ish tolerance.
    np.testing.assert_allclose(np.asarray(logits), np.asarray(ref),
                               rtol=2e-2, atol=2e-2)
    print("KERNEL_OK")
</pallas_src>

<mosaic_0001>
module attributes {stable_mosaic.version = 11 : i64} {
  func.func @_late_fusion_kernel(%arg0: i32, %arg1: memref<8x1xi32, #tpu.memory_space<vmem>>, %arg2: memref<8x128xbf16, #tpu.memory_space<vmem>>, %arg3: memref<8x768xbf16, #tpu.memory_space<vmem>>, %arg4: memref<128x128xbf16, #tpu.memory_space<vmem>>, %arg5: memref<768x128xbf16, #tpu.memory_space<vmem>>, %arg6: memref<1x128xf32, #tpu.memory_space<vmem>>, %arg7: memref<8x128xf32, #tpu.memory_space<vmem>>) attributes {dimension_semantics = [#tpu.dimension_semantics<parallel>], iteration_bounds = array<i64: 1>, scalar_prefetch = 0 : i64, scratch_operands = 0 : i64, tpu.core_type = #tpu.core_type<tc>, window_params = [{transform_indices = @transform_0, window_bounds = array<i64: 8, 1>}, {transform_indices = @transform_1, window_bounds = array<i64: 8, 128>}, {transform_indices = @transform_2, window_bounds = array<i64: 8, 768>}, {pipeline_mode = #tpu.pipeline_mode<synchronous>, transform_indices = @transform_3, window_bounds = array<i64: 128, 128>}, {pipeline_mode = #tpu.pipeline_mode<synchronous>, transform_indices = @transform_4, window_bounds = array<i64: 768, 128>}, {pipeline_mode = #tpu.pipeline_mode<synchronous>, transform_indices = @transform_5, window_bounds = array<i64: 1, 128>}, {transform_indices = @transform_6, window_bounds = array<i64: 8, 128>}]} {
    %c0 = arith.constant 0 : index
    %c0_0 = arith.constant 0 : index
    %0 = vector.load %arg2[%c0, %c0_0] : memref<8x128xbf16, #tpu.memory_space<vmem>>, vector<8x128xbf16>
    %c0_1 = arith.constant 0 : index
    %c0_2 = arith.constant 0 : index
    %1 = vector.load %arg1[%c0_1, %c0_2] : memref<8x1xi32, #tpu.memory_space<vmem>>, vector<8x1xi32>
    %2 = tpu.iota {dimensions = array<i32: 1>} : vector<8x128xi32>
    %3 = vector.broadcast %1 : vector<8x1xi32> to vector<8x128xi32>
    %4 = arith.cmpi slt, %2, %3 : vector<8x128xi32>
    %cst = arith.constant 0.000000e+00 : bf16
    %5 = vector.broadcast %cst : bf16 to vector<8x128xbf16>
    %6 = arith.select %4, %0, %5 : vector<8x128xi1>, vector<8x128xbf16>
    %c0_3 = arith.constant 0 : index
    %c0_4 = arith.constant 0 : index
    %7 = vector.load %arg4[%c0_3, %c0_4] : memref<128x128xbf16, #tpu.memory_space<vmem>>, vector<128x128xbf16>
    %cst_5 = arith.constant dense<0.000000e+00> : vector<8x128xf32>
    %8 = tpu.matmul %6, %7, %cst_5 {dimension_numbers = #tpu.dot_dimension_numbers<[1], [0], [0], [1], [0, 0, 1, 1], [], []>} : vector<8x128xbf16>, vector<128x128xbf16>, vector<8x128xf32> -> vector<8x128xf32>
    %c0_6 = arith.constant 0 : index
    %c0_7 = arith.constant 0 : index
    %9 = vector.load %arg3[%c0_6, %c0_7] : memref<8x768xbf16, #tpu.memory_space<vmem>>, vector<8x768xbf16>
    %c0_8 = arith.constant 0 : index
    %c0_9 = arith.constant 0 : index
    %10 = vector.load %arg5[%c0_8, %c0_9] : memref<768x128xbf16, #tpu.memory_space<vmem>>, vector<768x128xbf16>
    %cst_10 = arith.constant dense<0.000000e+00> : vector<8x128xf32>
    %11 = tpu.matmul %9, %10, %cst_10 {dimension_numbers = #tpu.dot_dimension_numbers<[1], [0], [0], [1], [0, 0, 1, 1], [], []>} : vector<8x768xbf16>, vector<768x128xbf16>, vector<8x128xf32> -> vector<8x128xf32>
    %12 = arith.addf %8, %11 : vector<8x128xf32>
    %c0_11 = arith.constant 0 : index
    %c0_12 = arith.constant 0 : index
    %13 = vector.load %arg6[%c0_11, %c0_12] : memref<1x128xf32, #tpu.memory_space<vmem>>, vector<1x128xf32>
    %14 = vector.broadcast %13 : vector<1x128xf32> to vector<8x128xf32>
    %15 = arith.addf %12, %14 : vector<8x128xf32>
    %c0_13 = arith.constant 0 : index
    %c0_14 = arith.constant 0 : index
    %16 = vector.load %arg7[%c0_13, %c0_14] : memref<8x128xf32, #tpu.memory_space<vmem>>, vector<8x128xf32>
    tpu.vector_store %arg7[%c0_13, %c0_14], %15 {strides = array<i32>} : memref<8x128xf32, #tpu.memory_space<vmem>>, vector<8x128xf32>,
    return
  }
  func.func @transform_0(%arg0: i32) -> (i32, i32) {
    %c0_i32 = arith.constant 0 : i32
    %c0_i32_0 = arith.constant 0 : i32
    return %arg0, %c0_i32 : i32, i32
  }
  func.func @transform_1(%arg0: i32) -> (i32, i32) {
    %c0_i32 = arith.constant 0 : i32
    %c0_i32_0 = arith.constant 0 : i32
    return %arg0, %c0_i32 : i32, i32
  }
  func.func @transform_2(%arg0: i32) -> (i32, i32) {
    %c0_i32 = arith.constant 0 : i32
    %c0_i32_0 = arith.constant 0 : i32
    return %arg0, %c0_i32 : i32, i32
  }
  func.func @transform_3(%arg0: i32) -> (i32, i32) {
    %c0_i32 = arith.constant 0 : i32
    %c0_i32_0 = arith.constant 0 : i32
    %c0_i32_1 = arith.constant 0 : i32
    return %c0_i32, %c0_i32_0 : i32, i32
  }
  func.func @transform_4(%arg0: i32) -> (i32, i32) {
    %c0_i32 = arith.constant 0 : i32
    %c0_i32_0 = arith.constant 0 : i32
    %c0_i32_1 = arith.constant 0 : i32
    return %c0_i32, %c0_i32_0 : i32, i32
  }
  func.func @transform_5(%arg0: i32) -> (i32, i32) {
    %c0_i32 = arith.constant 0 : i32
    %c0_i32_0 = arith.constant 0 : i32
    %c0_i32_1 = arith.constant 0 : i32
    return %c0_i32, %c0_i32_0 : i32, i32
  }
  func.func @transform_6(%arg0: i32) -> (i32, i32) {
    %c0_i32 = arith.constant 0 : i32
    %c0_i32_0 = arith.constant 0 : i32
    return %arg0, %c0_i32 : i32, i32
  }
}

</mosaic_0001>

<bundles_post_ra>
// kernel: tpu_custom_call.1
= control target key start
LH: loop header
LB: loop body
LE: loop exit
PB: predicated region body
PF: predicated region fallthrough
CT: control target
= control target key end

     0   :  { %11 = vsyncpa [#allocation3], 0  ;;  %s1162_s0 = inlined_call_operand.vmem [shape: s32[8,1], index: 0, kind: input, shape index: {}]   ;;  %s1163_s1 = inlined_call_operand.vmem [shape: bf16[8,128], index: 1, kind: input, shape index: {}]   ;;  %s1164_s2 = inlined_call_operand.hbm [shape: bf16[8,768], index: 2, kind: input, shape index: {}]   ;;  %s1165_s3 = inlined_call_operand.hbm [shape: bf16[128,128], index: 3, kind: input, shape index: {}]   ;;  %s1166_s4 = inlined_call_operand.hbm [shape: bf16[768,128], index: 4, kind: input, shape index: {}]   ;;  %s1167_s5 = inlined_call_operand.vmem [shape: f32[1,128], index: 5, kind: input, shape index: {}]   ;;  %s1168_s6 = inlined_call_operand.hbm [shape: f32[8,128], index: 6, kind: output, shape index: {}]  }
   0x1   :  { %12 = vsyncpa [#allocation6], 0 }
   0x2   :  { %13 = vsyncpa [#allocation4], 0  ;;  %s1055_s21 = smov [#allocation5]   ;;  %s961_s25 = scalar_lea.hbm %s1165_s3, 1024 }
   0x3   :  { %s33_s22 = sshll.u32 %s1055_s21, 4  ;;  %p962_p0 = scmp.ne.s32.totalorder %s1165_s3, %s961_s25  ;;  %s34_s22 = int_to_ptr.vmem [resolvable:$true] %s33_s22 }
   0x4   :  { %p965_p1 = scmp.lt.u32.totalorder %s961_s25, %s1165_s3 }
   0x6   :  { %p967_p2 = pnand %p965_p1, %p962_p0 }
   0x8   :  { %970 = shalt.err (!%p967_p2)
}
   0x9   :  { %s971_s30 = scalar_lea.vmem %s34_s22, 1024  ;;  %p976_p4 = scmp.lt.s32.totalorder %s34_s22, %s34_s22 }
   0xa   :  { %p972_p3 = scmp.ne.s32.totalorder %s34_s22, %s971_s30  ;;  %p977_p5 = scmp.lt.s32.totalorder %s971_s30, %s971_s30 }
   0xc   :  { %p978_p6 = por %p977_p5, %p976_p4 }
   0xe   :  { %p979_p7 = pnand %p978_p6, %p972_p3 }
  0x10   :  { %982 = shalt.err (!%p979_p7)
}
  0x11   :  { %s1056_s7 = smov 64   ;;  %s1057_s8 = smov 4  }
  0x12   :  { %39 = dma.hbm_to_vmem [thread:$0]  %s1165_s3, 1024, %s34_s22, [#allocation6], %s1056_s7, %s1056_s7, %s1057_s8  }
  0x13   :  { %s1058_s11 = smov [#allocation2]   ;;  %s1059_s13 = smov [#allocation7]  }
  0x14   :  { %s24_s12 = sshll.u32 %s1058_s11, 4  ;;  %s45_s14 = sshll.u32 %s1059_s13, 4  ;;  %s25_s12 = int_to_ptr.vmem [resolvable:$true] %s24_s12  ;;  %s46_s14 = int_to_ptr.vmem [resolvable:$true] %s45_s14 }
  0x15   :  { %s983_s17 = scalar_lea.hbm %s1164_s2, 384 }
  0x16   :  { %p984_p8 = scmp.ne.s32.totalorder %s1164_s2, %s983_s17  ;;  %p987_p9 = scmp.lt.u32.totalorder %s983_s17, %s1164_s2 }
  0x18   :  { %p989_p10 = pnand %p987_p9, %p984_p8 }
  0x1a   :  { %992 = shalt.err (!%p989_p10)
}
  0x1b   :  { %s993_s3 = scalar_lea.vmem %s25_s12, 384  ;;  %p998_p12 = scmp.lt.s32.totalorder %s25_s12, %s25_s12 }
  0x1c   :  { %p994_p11 = scmp.ne.s32.totalorder %s25_s12, %s993_s3  ;;  %p999_p13 = scmp.lt.s32.totalorder %s993_s3, %s993_s3 }
  0x1e   :  { %p1000_p0 = por %p999_p13, %p998_p12 }
  0x20   :  { %p1001_p1 = pnand %p1000_p0, %p994_p11 }
  0x22   :  { %1004 = shalt.err (!%p1001_p1)
}
  0x23   :  { %27 = dma.hbm_to_vmem [thread:$0]  %s1164_s2, 384, %s25_s12, [#allocation3]  }
  0x24   :  { %s1005_s26 = scalar_lea.hbm %s1166_s4, 6144 }
  0x25   :  { %p1006_p2 = scmp.ne.s32.totalorder %s1166_s4, %s1005_s26  ;;  %p1009_p3 = scmp.lt.u32.totalorder %s1005_s26, %s1166_s4 }
  0x27   :  { %p1011_p4 = pnand %p1009_p3, %p1006_p2 }
  0x29   :  { %1014 = shalt.err (!%p1011_p4)
}
  0x2a   :  { %s1015_s9 = scalar_lea.vmem %s46_s14, 6144  ;;  %p1020_p6 = scmp.lt.s32.totalorder %s46_s14, %s46_s14 }
  0x2b   :  { %p1016_p5 = scmp.ne.s32.totalorder %s46_s14, %s1015_s9  ;;  %p1021_p7 = scmp.lt.s32.totalorder %s1015_s9, %s1015_s9 }
  0x2d   :  { %p1022_p8 = por %p1021_p7, %p1020_p6 }
  0x2f   :  { %p1023_p9 = pnand %p1022_p8, %p1016_p5 }
  0x31   :  { %1026 = shalt.err (!%p1023_p9)
}
  0x32   :  { %51 = dma.hbm_to_vmem [thread:$0]  %s1166_s4, 6144, %s46_s14, [#allocation6], %s1056_s7, %s1056_s7, %s1057_s8  }
  0x33   :  { %1049 = dma.done.wait [#allocation3], 384  }
  0x34   :  { %1050 = vsyncadd [#allocation3], 4294966912 }
  0x35   :  { %1051 = dma.done.wait [#allocation6], 7168  }
  0x36   :  { %1052 = vsyncadd [#allocation6], 4294960128  ;;  %v1060_v0 = vmov 0   ;;  %v65_v1 = vld [vmem:[%s1162_s0] sm:$0xff]  ;;  %v899_v2 = vld [vmem:[#allocation7 + $0x40] sm:$0xff]   ;;  %v1061_v52 = vmov 0.0  }
  0x37   :  { %898 = vset.pattern.permute.xlu0 %v1060_v0  ;;  %v900_v3 = vld [vmem:[#allocation7] sm:$0xff]   ;;  %794 = vmatprep.subr.bf16.mxu0 %v899_v2  ;;  %v901_v4 = vld [vmem:[#allocation7 + $0x48] sm:$0xff]   ;;  %v903_v6 = vld [vmem:[#allocation7 + $0x50] sm:$0xff]   ;;  %vm1062_vm0 = vmmov 0   ;;  %s1063_s8 = smov [#allocation8]  }
  0x38   :  { %69 = vperm.xlu0 %898, %v65_v1   ;;  %795 = vmatpush3.bf16.msra.mxu0 %v900_v3  ;;  %v902_v5 = vld [vmem:[#allocation7 + $0x8] sm:$0xff]   ;;  %v904_v7 = vld [vmem:[#allocation7 + $0x10] sm:$0xff]   ;;  %v905_v8 = vld [vmem:[#allocation7 + $0x58] sm:$0xff]   ;;  %s721_s13 = sshll.u32 %s1063_s8, 4  ;;  %s722_s13 = int_to_ptr.vmem [resolvable:$true] %s721_s13 }
  0x39   :  { %796 = vmatprep.subr.bf16.mxu0 %v901_v4  ;;  %v906_v9 = vld [vmem:[#allocation7 + $0x18] sm:$0xff]   ;;  %v907_v10 = vld [vmem:[#allocation7 + $0x60] sm:$0xff]   ;;  %v909_v12 = vld [vmem:[#allocation7 + $0x68] sm:$0xff]   ;;  %v66_v4 = vlaneseq  ;;  %s1027_s14 = scalar_lea.vmem %s722_s13, 128  ;;  %p1032_p11 = scmp.lt.s32.totalorder %s722_s13, %s722_s13 }
  0x3a   :  { %v908_v11 = vld [vmem:[#allocation7 + $0x20] sm:$0xff]   ;;  %v90_v15 = vld [vmem:[#allocation2] sm:$0xff]  ;;  %v911_v18 = vld [vmem:[#allocation7 + $0x70] sm:$0xff]   ;;  %p1028_p10 = scmp.ne.s32.totalorder %s722_s13, %s1027_s14  ;;  %p1033_p12 = scmp.lt.s32.totalorder %s1027_s14, %s1027_s14 }
  0x3b   :  { %v915_v13 = vld [vmem:[#allocation7 + $0xc0] sm:$0xff]   ;;  %v910_v16 = vld [vmem:[#allocation7 + $0x28] sm:$0xff]   ;;  %v732_v17 = vcombine.high %v90_v15, %v90_v15  ;;  %v912_v21 = vld [vmem:[#allocation7 + $0x30] sm:$0xff]   ;;  %v731_v29 = vcombine.low %v90_v15, %v90_v15 }
  0x3c   :  { %797 = vmatpush3.bf16.msra.mxu0 %v902_v5  ;;  %v916_v14 = vld [vmem:[#allocation7 + $0x80] sm:$0xff]   ;;  %816 = vmatprep.subr.bf16.mxu1 %v915_v13  ;;  %v921_v19 = vld [vmem:[#allocation7 + $0xc8] sm:$0xff]   ;;  %v913_v22 = vld [vmem:[#allocation7 + $0x78] sm:$0xff]   ;;  %v67_v5 = vand.u32 127, %v66_v4  ;;  %p1034_p13 = por %p1033_p12, %p1032_p11 }
  0x3d   :  { %798 = vmatprep.subr.bf16.mxu0 %v903_v6  ;;  %817 = vmatpush3.bf16.msra.mxu1 %v916_v14  ;;  %v922_v20 = vld [vmem:[#allocation7 + $0x88] sm:$0xff]   ;;  %v925_v23 = vld [vmem:[#allocation7 + $0xd0] sm:$0xff]   ;;  %v914_v25 = vld [vmem:[#allocation7 + $0x38] sm:$0xff]  }
  0x3e   :  { %530 = vmatprep.mubr.bf16.mxu0 %v732_v17  ;;  %818 = vmatprep.subr.bf16.mxu1 %v921_v19  ;;  %v926_v24 = vld [vmem:[#allocation7 + $0x90] sm:$0xff]   ;;  %v919_v26 = vld [vmem:[#allocation7 + $0x140] sm:$0xff]   ;;  %v929_v27 = vld [vmem:[#allocation7 + $0xd8] sm:$0xff]   ;;  %p1035_p0 = pnand %p1034_p13, %p1028_p10 }
  0x3f   :  { %v930_v28 = vld [vmem:[#allocation7 + $0x98] sm:$0xff]   ;;  %v920_v30 = vld [vmem:[#allocation7 + $0x100] sm:$0xff]   ;;  %v923_v31 = vld [vmem:[#allocation7 + $0x148] sm:$0xff]  }
  0x40   :  { %799 = vmatpush3.bf16.msra.mxu0 %v904_v7  ;;  %v933_v32 = vld [vmem:[#allocation7 + $0xe0] sm:$0xff]   ;;  %v924_v34 = vld [vmem:[#allocation7 + $0x108] sm:$0xff]   ;;  %v927_v35 = vld [vmem:[#allocation7 + $0x150] sm:$0xff]  }
  0x41   :  { %800 = vmatprep.subr.bf16.mxu0 %v905_v8  ;;  %819 = vmatpush3.bf16.msra.mxu1 %v922_v20  ;;  %v934_v33 = vld [vmem:[#allocation7 + $0xa0] sm:$0xff]   ;;  %v937_v36 = vld [vmem:[#allocation7 + $0xe8] sm:$0xff]   ;;  %v928_v38 = vld [vmem:[#allocation7 + $0x110] sm:$0xff]  }
  0x42   :  { %820 = vmatprep.subr.bf16.mxu1 %v925_v23  ;;  %v938_v37 = vld [vmem:[#allocation7 + $0xa8] sm:$0xff]   ;;  %v931_v39 = vld [vmem:[#allocation7 + $0x158] sm:$0xff]   ;;  %v941_v40 = vld [vmem:[#allocation7 + $0xf0] sm:$0xff]  }
  0x43   :  { %v942_v41 = vld [vmem:[#allocation7 + $0xb0] sm:$0xff]   ;;  %v932_v42 = vld [vmem:[#allocation7 + $0x118] sm:$0xff]   ;;  %v935_v43 = vld [vmem:[#allocation7 + $0x160] sm:$0xff]  }
  0x44   :  { %801 = vmatpush3.bf16.msra.mxu0 %v906_v9  ;;  %v945_v44 = vld [vmem:[#allocation7 + $0xf8] sm:$0xff]   ;;  %v936_v46 = vld [vmem:[#allocation7 + $0x120] sm:$0xff]   ;;  %v91_v47 = vld [vmem:[#allocation2 + $0x8] sm:$0xff] }
  0x45   :  { %802 = vmatprep.subr.bf16.mxu0 %v907_v10  ;;  %821 = vmatpush3.bf16.msra.mxu1 %v926_v24  ;;  %v946_v45 = vld [vmem:[#allocation7 + $0xb8] sm:$0xff]   ;;  %v939_v48 = vld [vmem:[#allocation7 + $0x168] sm:$0xff]   ;;  %v733_v49 = vcombine.low %v91_v47, %v91_v47  ;;  %v734_v50 = vcombine.high %v91_v47, %v91_v47  ;;  %v953_v54 = vld [vmem:[#allocation5] sm:$0xff]  }
  0x46   :  { %822 = vmatprep.subr.bf16.mxu1 %v929_v27  ;;  %v92_v51 = vld [vmem:[#allocation2 + $0x10] sm:$0xff]  ;;  %v940_v55 = vld [vmem:[#allocation7 + $0x128] sm:$0xff]   ;;  %v943_v56 = vld [vmem:[#allocation7 + $0x170] sm:$0xff]  }
  0x47   :  { %570 = vmatprep.mubr.bf16.mxu1 %v734_v50  ;;  %v736_v53 = vcombine.high %v92_v51, %v92_v51  ;;  %v954_v57 = vld [vmem:[#allocation5 + $0x8] sm:$0xff]   ;;  %v944_v58 = vld [vmem:[#allocation7 + $0x130] sm:$0xff]   ;;  %v947_v59 = vld [vmem:[#allocation7 + $0x178] sm:$0xff]   ;;  %v735_v63 = vcombine.low %v92_v51, %v92_v51 }
  0x48   :  { %803 = vmatpush3.bf16.msra.mxu0 %v908_v11  ;;  %v955_v60 = vld [vmem:[#allocation5 + $0x10] sm:$0xff]   ;;  %v950_v61 = vld [vmem:[#allocation7 + $0x138] sm:$0xff]   ;;  %v957_v0 = vld [vmem:[#allocation5 + $0x20] sm:$0xff]  }
  0x49   :  { %804 = vmatprep.subr.bf16.mxu0 %v909_v12  ;;  %823 = vmatpush3.bf16.msra.mxu1 %v930_v28  ;;  %v956_v62 = vld [vmem:[#allocation5 + $0x18] sm:$0xff]   ;;  %v958_v1 = vld [vmem:[#allocation5 + $0x28] sm:$0xff]   ;;  %v959_v2 = vld [vmem:[#allocation5 + $0x30] sm:$0xff]  }
  0x4a   :  { %824 = vmatprep.subr.bf16.mxu1 %v933_v32  ;;  %v960_v3 = vld [vmem:[#allocation5 + $0x38] sm:$0xff]   ;;  %v64_v7 = vld [vmem:[%s1163_s1] sm:$0xf] }
  0x4b   :  { %v793_v27 = vld [vmem:[%s1167_s5] ss:$0 sm:$0xff] }
  0x4c   :  { %805 = vmatpush3.bf16.msra.mxu0 %v910_v16 }
  0x4d   :  { %806 = vmatprep.subr.bf16.mxu0 %v911_v18  ;;  %825 = vmatpush3.bf16.msra.mxu1 %v934_v33 }
  0x4e   :  { %826 = vmatprep.subr.bf16.mxu1 %v937_v36 }
  0x50   :  { %807 = vmatpush3.bf16.msra.mxu0 %v912_v21 }
  0x51   :  { %808 = vmatprep.subr.bf16.mxu0 %v913_v22  ;;  %827 = vmatpush3.bf16.msra.mxu1 %v938_v37 }
  0x52   :  { %828 = vmatprep.subr.bf16.mxu1 %v941_v40 }
  0x54   :  { %809 = vmatpush3.bf16.msra.mxu0 %v914_v25 }
  0x55   :  { %838 = vmatprep.subr.bf16.mxu0 %v919_v26  ;;  %829 = vmatpush3.bf16.msra.mxu1 %v942_v41 }
  0x56   :  { %830 = vmatprep.subr.bf16.mxu1 %v945_v44 }
  0x57   :  { %531 = vmatmul.mubr.bf16.vlgmr.msra.gmra.mrb[0].mxu0 %v731_v29 }
  0x58   :  { %839 = vmatpush3.bf16.msra.mxu0 %v920_v30  ;;  %610 = vmatprep.mubr.bf16.mxu0 %v736_v53 }
  0x59   :  { %840 = vmatprep.subr.bf16.mxu0 %v923_v31  ;;  %831 = vmatpush3.bf16.msra.mxu1 %v946_v45 }
  0x5a   :  { %869 = vmatprep.subr.bf16.mxu1 %v1061_v52 }
  0x5c   :  { %841 = vmatpush3.bf16.msra.mxu0 %v924_v34  ;;  %571 = vmatmul.mubr.bf16.vlgmr.msra.gmra.mrb[0].mxu1 %v733_v49 }
  0x5d   :  { %842 = vmatprep.subr.bf16.mxu0 %v927_v35  ;;  %870 = vmatpush3.bf16.msra.mxu1 %v953_v54 }
  0x5e   :  { %871 = vmatprep.subr.bf16.mxu1 %v1061_v52  ;;  %885 = vmatprep.mubr.msk.bf16.mxu1 %vm1062_vm0, %v1061_v52 }
  0x60   :  { %843 = vmatpush3.bf16.msra.mxu0 %v928_v38 }
  0x61   :  { %844 = vmatprep.subr.bf16.mxu0 %v931_v39  ;;  %872 = vmatpush3.bf16.msra.mxu1 %v954_v57 }
  0x62   :  { %873 = vmatprep.subr.bf16.mxu1 %v1061_v52 }
  0x64   :  { %845 = vmatpush3.bf16.msra.mxu0 %v932_v42 }
  0x65   :  { %846 = vmatprep.subr.bf16.mxu0 %v935_v43  ;;  %874 = vmatpush3.bf16.msra.mxu1 %v955_v60 }
  0x66   :  { %875 = vmatprep.subr.bf16.mxu1 %v1061_v52 }
  0x68   :  { %847 = vmatpush3.bf16.msra.mxu0 %v936_v46 }
  0x69   :  { %848 = vmatprep.subr.bf16.mxu0 %v939_v48  ;;  %876 = vmatpush3.bf16.msra.mxu1 %v956_v62 }
  0x6a   :  { %877 = vmatprep.subr.bf16.mxu1 %v1061_v52 }
  0x6c   :  { %849 = vmatpush3.bf16.msra.mxu0 %v940_v55 }
  0x6d   :  { %850 = vmatprep.subr.bf16.mxu0 %v943_v56  ;;  %878 = vmatpush3.bf16.msra.mxu1 %v957_v0 }
  0x6e   :  { %879 = vmatprep.subr.bf16.mxu1 %v1061_v52 }
  0x70   :  { %851 = vmatpush3.bf16.msra.mxu0 %v944_v58 }
  0x71   :  { %852 = vmatprep.subr.bf16.mxu0 %v947_v59  ;;  %880 = vmatpush3.bf16.msra.mxu1 %v958_v1 }
  0x72   :  { %881 = vmatprep.subr.bf16.mxu1 %v1061_v52 }
  0x74   :  { %853 = vmatpush3.bf16.msra.mxu0 %v950_v61 }
  0x75   :  { %882 = vmatpush3.bf16.msra.mxu1 %v959_v2 }
  0x76   :  { %883 = vmatprep.subr.bf16.mxu1 %v1061_v52 }
  0x77   :  { %611 = vmatmul.mubr.bf16.vlgmr.msra.gmra.mrb[4].mxu0 %v735_v63 }
  0x79   :  { %884 = vmatpush3.bf16.msra.mxu1 %v960_v3 }
  0xb7   :  { %v70_v6 = vpop.permute.xlu0 %69 }
  0xb8   :  { %vm71_vm1 = vcmp.lt.s32.totalorder %v67_v5, %v70_v6 }
  0xb9   :  { %vm72_vm2 = vmpackc.low %vm71_vm1, %vm71_vm1 }
  0xba   :  { %v73_v8 = vsel %vm72_vm2, %v64_v7, 0 }
  0xbb   :  { %886 = vmatmul.mubr.bf16.vlgmr.msra.gmra.mrb[4].mxu1 %v73_v8 }
 0x12a   :  { %v810_v9 = vpop.f32.mrb[0].mxu0 }
 0x12b   :  { %v811_v10 = vpop.f32.mrb[1].mxu0 }
 0x12c   :  { %v812_v11 = vadd.f32 %v811_v10, %v810_v9  ;;  %v813_v12 = vpop.f32.mrb[2].mxu0 }
 0x12d   :  { %v814_v13 = vpop.f32.mrb[3].mxu0 }
 0x12f   :  { %v832_v14 = vpop.f32.mrb[0].mxu1 }
 0x130   :  { %v833_v15 = vpop.f32.mrb[1].mxu1 }
 0x131   :  { %v834_v16 = vadd.f32 %v833_v15, %v832_v14  ;;  %v835_v17 = vpop.f32.mrb[2].mxu1 }
 0x132   :  { %v836_v18 = vpop.f32.mrb[3].mxu1 }
 0x133   :  { %v573_v19 = vadd.f32 %v834_v16, %v812_v11 }
 0x14a   :  { %v854_v20 = vpop.f32.mrb[4].mxu0 }
 0x14b   :  { %v855_v21 = vpop.f32.mrb[5].mxu0 }
 0x14c   :  { %v856_v22 = vadd.f32 %v855_v21, %v854_v20  ;;  %v857_v23 = vpop.f32.mrb[6].mxu0 }
 0x14d   :  { %v858_v24 = vpop.f32.mrb[7].mxu0 }
 0x14e   :  { %v613_v25 = vadd.f32 %v856_v22, %v573_v19 }
 0x18e   :  { %v700_v26 = vpop.f32.mrb[4].mxu1 }
 0x18f   :  { %v701_v28 = vadd.f32 %v700_v26, %v613_v25  ;;  %v887_v29 = vpop.f32.mrb[5].mxu1 }
 0x190   :  { %v703_v30 = vpop.f32.mrb[6].mxu1 }
 0x191   :  { %v713_v31 = vadd.f32 %v793_v27, %v701_v28  ;;  %v888_v32 = vpop.f32.mrb[7].mxu1 }
 0x193   :  { %714 = vst [vmem:[#allocation8] sm:$0xff] %v713_v31 }
 0x194   :  { %1038 = shalt.err (!%p1035_p0)
}
 0x195   :  { %s1039_s5 = scalar_lea.hbm %s1168_s6, 128 }
 0x196   :  { %p1040_p1 = scmp.ne.s32.totalorder %s1168_s6, %s1039_s5  ;;  %p1043_p2 = scmp.lt.u32.totalorder %s1039_s5, %s1168_s6 }
 0x198   :  { %p1045_p3 = pnand %p1043_p2, %p1040_p1 }
 0x19a   :  { %1048 = shalt.err (!%p1045_p3)
}
 0x19b   :  { %724 = dma.vmem_to_hbm [thread:$0]  %s722_s13, 128, %s1168_s6, [#allocation4]  }
 0x19c   :  { %1053 = dma.done.wait [#allocation4], 128  }
 0x19d   :  { %1054 = vsyncadd [#allocation4], 4294967168 }
 0x19e   :  { %728 = vsyncpa [#allocation3], 1 }
 0x19f   :  { %729 = vsyncpa [#allocation6], 1 }
 0x1a0   :  { %730 = vsyncpa [#allocation4], 1 }

</bundles_post_ra>
